<compile_context>
chip_gen: v5e
topology: v5e:2x2
jax: 0.10.0
libtpu: 0.0.40
codegen_flags: <defaults>
</compile_context>

<pallas_src>
import functools
import math

import jax
import jax.numpy as jnp
from jax import lax
from jax.experimental import pallas as pl
from jax.experimental.pallas import tpu as pltpu


def _cdiv(a, b):
    return -(-a // b)


def _round_up(a, b):
    return _cdiv(a, b) * b


def _taylor_ce_kernel(logits_ref, labels_ref, out_ref, acc_ref, *,
                      n, num_classes, smoothing, n_valid, tile_n,
                      tiles_per_split):
    """Per-tile body.

    logits_ref: (C, TILE_N)   classes on sublanes, batch on lanes
    labels_ref: (1, TILE_N)   int32 class indices
    out_ref:    (1, 8, 128)   per-split partial loss sum (broadcast-filled, lane-dense)
    acc_ref:    (1, TILE_N)   VMEM accumulator of per-example losses
    """
    c = pl.program_id(0)   # core / split index ("parallel")
    j = pl.program_id(1)   # tile index within the split ("arbitrary")

    @pl.when(j == 0)
    def _init():
        acc_ref[...] = jnp.zeros_like(acc_ref)

    x = logits_ref[...].astype(jnp.float32)                       # (C, TILE_N)

    # TaylorSoftmax numerator: sum_{i=0}^{n} x^i / i!, Horner form (VALU only).
    fn = jnp.full_like(x, 1.0 / math.factorial(n))
    for i in range(n - 1, -1, -1):
        fn = fn * x + (1.0 / math.factorial(i))

    # log(taylor_softmax(x)); the reference's subsequent log_softmax is an identity
    # (rows of probs sum to 1 -> logsumexp(log_probs) == 0), so it is dropped.
    log_fn = jnp.log(fn)                                          # (C, TILE_N)  EUP
    sum_fn = jnp.sum(fn, axis=0, keepdims=True)                   # (1, TILE_N)  sublane reduce
    log_sum = jnp.log(sum_fn)                                     # (1, TILE_N)

    # sum_c pred  where pred = log_fn - log_sum
    sum_pred = jnp.sum(log_fn, axis=0, keepdims=True) - num_classes * log_sum

    # pred at the target class, via a masked sublane reduce.
    labels = labels_ref[...]                                      # (1, TILE_N) int32
    row_ids = lax.broadcasted_iota(jnp.int32, x.shape, 0)         # (C, TILE_N)
    log_fn_at_lbl = jnp.sum(jnp.where(row_ids == labels, log_fn, 0.0),
                            axis=0, keepdims=True)                # (1, TILE_N)
    pred_at_lbl = log_fn_at_lbl - log_sum

    confidence = 1.0 - smoothing
    off_value = smoothing / (num_classes - 1)
    # sum_c(-true_dist * pred) = -(off * sum_c(pred) + (conf - off) * pred[label])
    per_example = -(off_value * sum_pred
                    + (confidence - off_value) * pred_at_lbl)     # (1, TILE_N)

    # Mask padded batch positions of the (possibly partial) last tile.
    base = (c * tiles_per_split + j) * tile_n
    batch_idx = base + lax.broadcasted_iota(jnp.int32, (1, tile_n), 1)
    per_example = jnp.where(batch_idx < n_valid, per_example, 0.0)

    acc_ref[...] += per_example

    @pl.when(j == tiles_per_split - 1)
    def _finalize():
        total = jnp.sum(acc_ref[...])
        out_ref[...] = jnp.full(out_ref.shape, total, dtype=out_ref.dtype)


def taylor_cross_entropy_loss(logits, labels, *, n=2, num_classes=18,
                              ignore_index=-1, smoothing=0.2,
                              tile_n=2048, num_splits=2):
    """JAX/Pallas equivalent of TaylorCrossEntropyLoss.forward (reduction='mean').

    logits: [N, num_classes] float, labels: [N] int. Returns scalar f32 loss.
    """
    assert n % 2 == 0
    N, C = logits.shape
    assert C == num_classes
    # TODO(synk): ignore_index is accepted but never applied — this matches the
    # PyTorch reference forward, which assumes all labels are valid class indices.
    del ignore_index

    # Tiling: split batch across num_splits (TensorCores on v7x), tile each split.
    per_split = _cdiv(N, num_splits)
    tile = max(128, min(tile_n, _round_up(per_split, 128)))
    tiles_per_split = _cdiv(per_split, tile)
    n_pad = num_splits * tiles_per_split * tile

    # Lane-dense layout: batch -> lanes, classes -> sublanes.
    xt = jnp.pad(logits, ((0, n_pad - N), (0, 0))).T              # (C, n_pad)
    lbl = jnp.pad(labels.astype(jnp.int32), (0, n_pad - N)).reshape(1, n_pad)

    kernel = functools.partial(
        _taylor_ce_kernel, n=n, num_classes=num_classes, smoothing=smoothing,
        n_valid=N, tile_n=tile, tiles_per_split=tiles_per_split)

    cost = pl.CostEstimate(
        flops=10 * n_pad * C,
        transcendentals=n_pad * (C + 1),
        bytes_accessed=(xt.size * xt.dtype.itemsize
                        + lbl.size * 4
                        + num_splits * 8 * 128 * 4),
    )

    partials = pl.pallas_call(
        kernel,
        out_shape=jax.ShapeDtypeStruct((num_splits, 8, 128), jnp.float32),
        grid=(num_splits, tiles_per_split),
        in_specs=[
            pl.BlockSpec((C, tile), lambda c, j: (0, c * tiles_per_split + j)),
            pl.BlockSpec((1, tile), lambda c, j: (0, c * tiles_per_split + j)),
        ],
        out_specs=pl.BlockSpec((1, 8, 128), lambda c, j: (c, 0, 0)),
        scratch_shapes=[pltpu.VMEM((1, tile), jnp.float32)],
        compiler_params=pltpu.CompilerParams(
            dimension_semantics=("parallel", "arbitrary")),
        cost_estimate=cost,
    )(xt, lbl)

    return jnp.sum(partials[:, 0, 0]) / N


def _reference_loss(logits, labels, *, n=2, num_classes=18, smoothing=0.2):
    """Pure-JAX reference mirroring the PyTorch code exactly (incl. redundant log_softmax)."""
    x = logits.astype(jnp.float32)
    fn = jnp.ones_like(x)
    denor = 1.0
    for i in range(1, n + 1):
        denor *= float(i)
        fn = fn + (x ** i) / denor
    probs = fn / jnp.sum(fn, axis=1, keepdims=True)
    log_probs = jnp.log(probs)
    pred = jax.nn.log_softmax(log_probs, axis=-1)
    confidence = 1.0 - smoothing
    true_dist = jnp.full_like(pred, smoothing / (num_classes - 1))
    true_dist = true_dist.at[jnp.arange(x.shape[0]), labels].set(confidence)
    return jnp.mean(jnp.sum(-true_dist * pred, axis=-1))


if __name__ == "__main__":
    key = jax.random.PRNGKey(0)
    k1, k2, k3, k4 = jax.random.split(key, 4)
    num_classes = 18

    # Small case consistent with the module (single tile per split).
    batch = 8
    logits = jax.random.normal(k1, (batch, num_classes), dtype=jnp.float32)
    labels = jax.random.randint(k2, (batch,), 0, num_classes, dtype=jnp.int32)
    loss = jax.block_until_ready(
        taylor_cross_entropy_loss(logits, labels, n=2, num_classes=num_classes,
                                  smoothing=0.2))
    ref = jax.block_until_ready(
        _reference_loss(logits, labels, n=2, num_classes=num_classes, smoothing=0.2))
    assert jnp.allclose(loss, ref, atol=1e-5, rtol=1e-4), (loss, ref)

    # Non-multiple batch: exercises cross-split tiling and tail masking.
    batch2 = 333
    logits2 = jax.random.normal(k3, (batch2, num_classes), dtype=jnp.float32)
    labels2 = jax.random.randint(k4, (batch2,), 0, num_classes, dtype=jnp.int32)
    loss2 = jax.block_until_ready(
        taylor_cross_entropy_loss(logits2, labels2, n=2, num_classes=num_classes,
                                  smoothing=0.2))
    ref2 = jax.block_until_ready(
        _reference_loss(logits2, labels2, n=2, num_classes=num_classes, smoothing=0.2))
    assert jnp.allclose(loss2, ref2, atol=1e-5, rtol=1e-4), (loss2, ref2)

    print("KERNEL_OK")
</pallas_src>

<mosaic_0001>
module attributes {stable_mosaic.version = 11 : i64} {
  func.func @_taylor_ce_kernel(%arg0: i32, %arg1: i32, %arg2: memref<18x128xf32, #tpu.memory_space<vmem>>, %arg3: memref<1x128xi32, #tpu.memory_space<vmem>>, %arg4: memref<1x8x128xf32, #tpu.memory_space<vmem>>, %arg5: memref<1x128xf32, #tpu.memory_space<vmem>>) attributes {dimension_semantics = [#tpu.dimension_semantics<parallel>, #tpu.dimension_semantics<arbitrary>], iteration_bounds = array<i64: 2, 1>, scalar_prefetch = 0 : i64, scratch_operands = 1 : i64, tpu.core_type = #tpu.core_type<tc>, window_params = [{transform_indices = @transform_0, window_bounds = array<i64: 18, 128>}, {transform_indices = @transform_1, window_bounds = array<i64: 1, 128>}, {transform_indices = @transform_2, window_bounds = array<i64: 1, 8, 128>}]} {
    %c0_i32 = arith.constant 0 : i32
    %0 = arith.cmpi eq, %arg1, %c0_i32 : i32
    %1 = arith.extui %0 : i1 to i32
    %c0_i32_0 = arith.constant 0 : i32
    %2 = arith.cmpi ne, %1, %c0_i32_0 : i32
    scf.if %2 {
      %cst_21 = arith.constant 0.000000e+00 : f32
      %52 = vector.broadcast %cst_21 : f32 to vector<1x128xf32>
      %c0_22 = arith.constant 0 : index
      %c0_23 = arith.constant 0 : index
      %53 = vector.load %arg5[%c0_22, %c0_23] : memref<1x128xf32, #tpu.memory_space<vmem>>, vector<1x128xf32>
      tpu.vector_store %arg5[%c0_22, %c0_23], %52 {strides = array<i32>} : memref<1x128xf32, #tpu.memory_space<vmem>>, vector<1x128xf32>,
    } else {
    }
    %c0 = arith.constant 0 : index
    %c0_1 = arith.constant 0 : index
    %3 = vector.load %arg2[%c0, %c0_1] : memref<18x128xf32, #tpu.memory_space<vmem>>, vector<18x128xf32>
    %cst = arith.constant 5.000000e-01 : f32
    %4 = vector.broadcast %cst : f32 to vector<18x128xf32>
    %5 = arith.mulf %4, %3 : vector<18x128xf32>
    %cst_2 = arith.constant 1.000000e+00 : f32
    %6 = vector.broadcast %cst_2 : f32 to vector<18x128xf32>
    %7 = arith.addf %5, %6 : vector<18x128xf32>
    %8 = arith.mulf %7, %3 : vector<18x128xf32>
    %cst_3 = arith.constant 1.000000e+00 : f32
    %9 = vector.broadcast %cst_3 : f32 to vector<18x128xf32>
    %10 = arith.addf %8, %9 : vector<18x128xf32>
    %11 = math.log %10 : vector<18x128xf32>
    %cst_4 = arith.constant dense<0.000000e+00> : vector<128xf32>
    %12 = vector.multi_reduction <add>, %10, %cst_4 [0] : vector<18x128xf32> to vector<128xf32>
    %13 = vector.shape_cast %12 : vector<128xf32> to vector<1x128xf32>
    %14 = math.log %13 : vector<1x128xf32>
    %cst_5 = arith.constant dense<0.000000e+00> : vector<128xf32>
    %15 = vector.multi_reduction <add>, %11, %cst_5 [0] : vector<18x128xf32> to vector<128xf32>
    %16 = vector.shape_cast %15 : vector<128xf32> to vector<1x128xf32>
    %cst_6 = arith.constant 1.800000e+01 : f32
    %17 = vector.broadcast %cst_6 : f32 to vector<1x128xf32>
    %18 = arith.mulf %17, %14 : vector<1x128xf32>
    %19 = arith.subf %16, %18 : vector<1x128xf32>
    %c0_7 = arith.constant 0 : index
    %c0_8 = arith.constant 0 : index
    %20 = vector.load %arg3[%c0_7, %c0_8] : memref<1x128xi32, #tpu.memory_space<vmem>>, vector<1x128xi32>
    %21 = tpu.iota {dimensions = array<i32: 0>} : vector<18x128xi32>
    %22 = vector.broadcast %20 : vector<1x128xi32> to vector<18x128xi32>
    %23 = arith.cmpi eq, %21, %22 : vector<18x128xi32>
    %cst_9 = arith.constant 0.000000e+00 : f32
    %24 = vector.broadcast %cst_9 : f32 to vector<18x128xf32>
    %25 = arith.select %23, %11, %24 : vector<18x128xi1>, vector<18x128xf32>
    %cst_10 = arith.constant dense<0.000000e+00> : vector<128xf32>
    %26 = vector.multi_reduction <add>, %25, %cst_10 [0] : vector<18x128xf32> to vector<128xf32>
    %27 = vector.shape_cast %26 : vector<128xf32> to vector<1x128xf32>
    %28 = arith.subf %27, %14 : vector<1x128xf32>
    %cst_11 = arith.constant 0.0117647061 : f32
    %29 = vector.broadcast %cst_11 : f32 to vector<1x128xf32>
    %30 = arith.mulf %29, %19 : vector<1x128xf32>
    %cst_12 = arith.constant 0.788235306 : f32
    %31 = vector.broadcast %cst_12 : f32 to vector<1x128xf32>
    %32 = arith.mulf %31, %28 : vector<1x128xf32>
    %33 = arith.addf %30, %32 : vector<1x128xf32>
    %cst_13 = arith.constant 0.000000e+00 : f32
    %34 = vector.broadcast %cst_13 : f32 to vector<1x128xf32>
    %35 = arith.subf %34, %33 : vector<1x128xf32>
    %c1_i32 = arith.constant 1 : i32
    %36 = arith.muli %arg0, %c1_i32 : i32
    %37 = arith.addi %36, %arg1 : i32
    %c128_i32 = arith.constant 128 : i32
    %38 = arith.muli %37, %c128_i32 : i32
    %39 = tpu.iota {dimensions = array<i32: 1>} : vector<1x128xi32>
    %40 = vector.broadcast %38 : i32 to vector<1x128xi32>
    %41 = arith.addi %40, %39 : vector<1x128xi32>
    %c8_i32 = arith.constant 8 : i32
    %42 = vector.broadcast %c8_i32 : i32 to vector<1x128xi32>
    %43 = arith.cmpi slt, %41, %42 : vector<1x128xi32>
    %cst_14 = arith.constant 0.000000e+00 : f32
    %44 = vector.broadcast %cst_14 : f32 to vector<1x128xf32>
    %45 = arith.select %43, %35, %44 : vector<1x128xi1>, vector<1x128xf32>
    %c0_15 = arith.constant 0 : index
    %c0_16 = arith.constant 0 : index
    %46 = vector.load %arg5[%c0_15, %c0_16] : memref<1x128xf32, #tpu.memory_space<vmem>>, vector<1x128xf32>
    %47 = arith.addf %46, %45 : vector<1x128xf32>
    %c0_17 = arith.constant 0 : index
    %c0_18 = arith.constant 0 : index
    %48 = vector.load %arg5[%c0_17, %c0_18] : memref<1x128xf32, #tpu.memory_space<vmem>>, vector<1x128xf32>
    tpu.vector_store %arg5[%c0_17, %c0_18], %47 {strides = array<i32>} : memref<1x128xf32, #tpu.memory_space<vmem>>, vector<1x128xf32>,
    %c0_i32_19 = arith.constant 0 : i32
    %49 = arith.cmpi eq, %arg1, %c0_i32_19 : i32
    %50 = arith.extui %49 : i1 to i32
    %c0_i32_20 = arith.constant 0 : i32
    %51 = arith.cmpi ne, %50, %c0_i32_20 : i32
    scf.if %51 {
      %c0_21 = arith.constant 0 : index
      %c0_22 = arith.constant 0 : index
      %52 = vector.load %arg5[%c0_21, %c0_22] : memref<1x128xf32, #tpu.memory_space<vmem>>, vector<1x128xf32>
      %53 = vector.shape_cast %52 : vector<1x128xf32> to vector<1x1x128xf32>
      %cst_23 = arith.constant dense<0.000000e+00> : vector<1xf32>
      %54 = vector.multi_reduction <add>, %53, %cst_23 [1, 2] : vector<1x1x128xf32> to vector<1xf32>
      %55 = vector.shape_cast %54 : vector<1xf32> to vector<1x1x1xf32>
      %56 = vector.extract %55[0, 0, 0] : f32 from vector<1x1x1xf32>
      %57 = vector.broadcast %56 : f32 to vector<1x8x128xf32>
      %c0_24 = arith.constant 0 : index
      %c0_25 = arith.constant 0 : index
      %c0_26 = arith.constant 0 : index
      %58 = vector.load %arg4[%c0_24, %c0_25, %c0_26] : memref<1x8x128xf32, #tpu.memory_space<vmem>>, vector<1x8x128xf32>
      tpu.vector_store %arg4[%c0_24, %c0_25, %c0_26], %57 {strides = array<i32>} : memref<1x8x128xf32, #tpu.memory_space<vmem>>, vector<1x8x128xf32>,
    } else {
    }
    return
  }
  func.func @transform_0(%arg0: i32, %arg1: i32) -> (i32, i32) {
    %c1_i32 = arith.constant 1 : i32
    %0 = arith.muli %arg0, %c1_i32 : i32
    %1 = arith.addi %0, %arg1 : i32
    %c0_i32 = arith.constant 0 : i32
    %c0_i32_0 = arith.constant 0 : i32
    return %c0_i32, %1 : i32, i32
  }
  func.func @transform_1(%arg0: i32, %arg1: i32) -> (i32, i32) {
    %c1_i32 = arith.constant 1 : i32
    %0 = arith.muli %arg0, %c1_i32 : i32
    %1 = arith.addi %0, %arg1 : i32
    %c0_i32 = arith.constant 0 : i32
    %c0_i32_0 = arith.constant 0 : i32
    return %c0_i32, %1 : i32, i32
  }
  func.func @transform_2(%arg0: i32, %arg1: i32) -> (i32, i32, i32) {
    %c0_i32 = arith.constant 0 : i32
    %c0_i32_0 = arith.constant 0 : i32
    %c0_i32_1 = arith.constant 0 : i32
    return %arg0, %c0_i32, %c0_i32_0 : i32, i32, i32
  }
}

</mosaic_0001>

<bundles_post_ra>
// kernel: tpu_custom_call.1
= control target key start
LH: loop header
LB: loop body
LE: loop exit
PB: predicated region body
PF: predicated region fallthrough
CT: control target
= control target key end

     0   :  { %7 = vsyncpa [#allocation4], 0  ;;  %s842_s0 = inlined_call_operand.hbm [shape: f32[18,256], index: 0, kind: input, shape index: {}]   ;;  %s843_s1 = inlined_call_operand.hbm [shape: s32[1,256], index: 1, kind: input, shape index: {}]   ;;  %s844_s2 = inlined_call_operand.hbm [shape: f32[2,8,128], index: 2, kind: output, shape index: {}]  }
   0x1   :  { %9 = vsyncpa [#allocation4 + $0x1], 0 }
   0x2   :  { %10 = vsyncpa [#allocation7], 0 }
   0x3   :  { %12 = vsyncpa [#allocation7 + $0x1], 0 }
   0x4   :  { %13 = vsyncpa [#allocation5], 0 }
   0x5   :  { %15 = vsyncpa [#allocation5 + $0x1], 0  ;;  %s699_s9 = smov 0   ;;  %s701_s10 = smov 0  }
   0x6   :  { %s703_s11 = smov 0   ;;  %s705_s12 = smov 0  }
   0x7   :  { %s707_s13 = smov 0   ;;  %s709_s14 = smov 0  }
   0x8 LB: > { %s436_s15 = sadd.s32 4294967295, %s678_s14   ;;  %s437_s16 = sadd.s32 4294967294, %s678_s14   ;;  %s678_s14 = sphi %s709_s14, %s21_s14   ;;  %s674_s13 = sphi %s707_s13, %s854_s13   ;;  %s670_s12 = sphi %s705_s12, %s853_s12   ;;  %s666_s11 = sphi %s703_s11, %s852_s11   ;;  %s662_s10 = sphi %s701_s10, %s851_s10   ;;  %s658_s9 = sphi %s699_s9, %s850_s9  }
   0x9   : > { %s33_s17 = sadd.s32 1, %s674_s13  ;;  %s42_s18 = sadd.s32 1, %s666_s11 }
   0xa   : > { %p35_p0 = scmp.ge.s32.totalorder %s33_s17, 2  ;;  %p49_p1 = scmp.ne.s32.totalorder %s666_s11, %s662_s10 }
   0xb   : > { %p50_p2 = scmp.eq.s32.totalorder %s678_s14, 0  ;;  %p55_p3 = scmp.ne.s32.totalorder %s662_s10, %s658_s9 }
   0xc   : > { %s856_s17 = smov (%p35_p0, %s33_s17), 0  ;;  %p56_p5 = scmp.eq.s32.totalorder %s436_s15, 0 }
   0xd   : > { %p740_p4 = por %p50_p2, %p49_p1  ;;  %s39_s20 = ssub.s32 %s674_s13, %s856_s17 }
   0xe   : > { %p107_p6 = scmp.eq.s32.totalorder %s436_s15, 1  ;;  %p40_p7 = scmp.eq.s32.totalorder %s39_s20, 0 }
   0xf   : > { %p746_p8 = por %p56_p5, %p55_p3  ;;  %p113_p10 = scmp.eq.s32.totalorder %s437_s16, 1 }
  0x10   : > { %p750_p9 = por %p107_p6, %p49_p1  ;;  %p439_p12 = scmp.ge.s32.totalorder %s678_s14, 2 }
  0x11   : > { %s755_s23 = scalar_select %p40_p7, %s666_s11, %s42_s18  }
  0x12   : > { %p757_p11 = por %p113_p10, %p55_p3  ;;  %p469_p13 = scmp.lt.s32.totalorder %s678_s14, 2 }
  0x13   : > { %s133_s25 = sand.u32 1, %s666_s11   ;;  %s440_s27 = sshll.u32 %s674_s13, 3 }
  0x14   : > { %s448_s26 = smul.u32 24, %s133_s25  ;;  %p767_p0 = pnand %p469_p13, %p740_p4 }
  0x15   : > { %s142_s3 = scalar_lea.hbm %s842_s0, %s440_s27  ;;  %s134_s7 = scalar_lea.sflag [#allocation4], %s133_s25 }
  0x16   : > { %s143_s4 = sshll.u32 %s142_s3, 4  ;;  %s137_s5 = scalar_lea.vmem [#allocation3], %s448_s26  ;;  %s144_s4 = int_to_ptr.hbm [resolvable:$true] %s143_s4 }
  0x17   : > { %s145_s6 = sshll.u32 %s137_s5, 4  ;;  %s680_s8 = smov 256   ;;  %s146_s6 = int_to_ptr.vmem [resolvable:$true] %s145_s6 }
  0x18   : > { %s681_s15 = smov 128   ;;  %s682_s16 = smov 8  }
  0x19   : > { %461 = dma.hbm_to_vmem [thread:$0]  (!%p767_p0), %s144_s4, 384, %s146_s6, %s134_s7, %s680_s8, %s681_s15, %s682_s16  }
  0x1a   : > { %p441_p1 = scmp.ge.s32.totalorder %s678_s14, 1  ;;  %p171_p2 = scmp.lt.s32.totalorder %s678_s14, 3 }
  0x1b   : > { %s162_s20 = scalar_lea.hbm %s843_s1, %s674_s13  ;;  %s158_s29 = scalar_lea.vmem [#allocation6], %s133_s25 }
  0x1c   : > { %p172_p3 = pnand %p441_p1, %p171_p2  ;;  %s164_s27 = sshll.u32 %s162_s20, 4  ;;  %s165_s27 = int_to_ptr.hbm [resolvable:$true] %s164_s27 }
  0x1d   : > { %s166_s26 = sshll.u32 %s158_s29, 4  ;;  %s156_s30 = scalar_lea.sflag [#allocation7], %s133_s25  ;;  %s167_s26 = int_to_ptr.vmem [resolvable:$true] %s166_s26 }
  0x1e   : > { %464 = dma.hbm_to_vmem [thread:$0]  (!%p767_p0), %s165_s27, 16, %s167_s26, %s156_s30  }
  0x1f   : > { %175 = sbr.rel (%p172_p3) target bundleno = 277 (0x115), region = 28  ;;  %s785_s3 = sand.u32 (!%p172_p3), 1, %s662_s10  }
  0x20   : > { %s449_s4 = smul.u32 (!%p172_p3), 24, %s785_s3  ;;  %s178_s5 = scalar_lea.sflag (!%p172_p3), [#allocation4], %s785_s3 }
  0x22   : > { %s181_s6 = scalar_lea.vmem (!%p172_p3), [#allocation3], %s449_s4 }
  0x24   : > { %645 = dma.done.wait (%p746_p8), %s178_s5, 384  }
  0x25   : > { %647 = vsyncadd (%p746_p8), %s178_s5, 4294966912  ;;  %s188_s25 = scalar_lea.sflag [#allocation7], %s785_s3  ;;  %s190_s28 = scalar_lea.vmem [#allocation6], %s785_s3 }
  0x26   : > { %649 = dma.done.wait (%p746_p8), %s188_s25, 16  }
  0x27   : > { %651 = vsyncadd (%p746_p8), %s188_s25, 4294967280  ;;  %v683_v0 = vmov 0.0   ;;  %v223_v1 = vld [vmem:[%s181_s6] sm:$0xff]  ;;  %v224_v2 = vld [vmem:[%s181_s6 + $0x8] sm:$0xff]  ;;  %v268_v10 = vlaneseq  ;;  %vm245_vm0 = vcmask 1041408   ;;  %s443_s21 = sshll.u32 %s670_s12, 7 }
  0x28   : > { %222 = vst [vmem:[#allocation2] sm:$0x1] %v683_v0  ;;  %v225_v3 = vld [vmem:[%s181_s6 + $0x10] sm:$0x3]  ;;  %v226_v4 = vmul.f32 0.5, %v223_v1  ;;  %v227_v5 = vmul.f32 0.5, %v224_v2  ;;  %v297_v61 = vstv %s443_s21 }
  0x29   : > { %v228_v6 = vmul.f32 0.5, %v225_v3  ;;  %v269_v17 = vshrl.u32 %v268_v10, 7  ;;  %v523_v21 = vld [vmem:[%s190_s28] ss:$0 sm:$0xff]  ;;  %v296_v58 = vand.u32 127, %v268_v10  ;;  %vm308_vm5 = vcmask 1040384  }
  0x2a   : > { %v229_v7 = vadd.f32 1.0, %v226_v4  ;;  %v230_v8 = vadd.f32 1.0, %v227_v5  ;;  %s442_s7 = sshll.u32 %s785_s3, 3  ;;  %s445_s8 = sshll.u32 %s670_s12, 3 }
  0x2b   : > { %v231_v9 = vadd.f32 1.0, %v228_v6  ;;  %v270_v22 = vadd.s32 8, %v269_v17  ;;  %v271_v24 = vadd.s32 16, %v269_v17  ;;  %vm273_vm1 = vcmp.eq.s32.totalorder %v269_v17, %v523_v21  ;;  %s332_s18 = scalar_lea.hbm %s844_s2, %s445_s8  ;;  %s215_s19 = scalar_lea.vmem [#allocation8], %s442_s7 }
  0x2c   : > { %v232_v11 = vmul.f32 %v229_v7, %v223_v1  ;;  %v233_v12 = vmul.f32 %v230_v8, %v224_v2  ;;  %v298_v0 = vadd.s32 %v297_v61, %v296_v58  ;;  %s334_s20 = sshll.u32 %s215_s19, 4  ;;  %s336_s27 = sshll.u32 %s332_s18, 4  ;;  %s335_s20 = int_to_ptr.vmem [resolvable:$true] %s334_s20  ;;  %s337_s27 = int_to_ptr.hbm [resolvable:$true] %s336_s27 }
  0x2d   : > { %v234_v13 = vmul.f32 %v231_v9, %v225_v3  ;;  %vm274_vm2 = vcmp.eq.s32.totalorder %v270_v22, %v523_v21  ;;  %vm275_vm3 = vcmp.eq.s32.totalorder %v271_v24, %v523_v21  ;;  %s322_s26 = scalar_lea.sflag [#allocation5], %s785_s3  ;;  %s606_s30 = sshra.s32 %s337_s27, 4  ;;  %s607_s30 = int_to_ptr.hbm [resolvable:$true] %s606_s30 }
  0x2e   : > { %v235_v14 = vadd.f32 1.0, %v232_v11  ;;  %v236_v15 = vadd.f32 1.0, %v233_v12  ;;  %vm299_vm4 = vcmp.lt.s32.totalorder %v298_v0, 8  ;;  %s608_s4 = scalar_lea.hbm %s607_s30, 8  ;;  %s612_s6 = scalar_lea.hbm %s844_s2, 16 }
  0x2f   : > { %v237_v16 = vadd.f32 1.0, %v234_v13  ;;  %v301_v5 = vld [vmem:[#allocation2] sm:$0x1]  ;;  %p609_p4 = scmp.ne.s32.totalorder %s607_s30, %s608_s4  ;;  %p613_p7 = scmp.lt.s32.totalorder %s607_s30, %s844_s2 }
  0x30   : > { %524 = vlog2.f32 %v235_v14  ;;  %v244_v18 = vadd.f32 %v236_v15, %v235_v14  ;;  %p614_p8 = scmp.lt.s32.totalorder %s612_s6, %s608_s4 }
  0x31   : > { %v246_v19 = vsel %vm245_vm0, %v237_v16, 0.0  ;;  %526 = vlog2.f32 %v236_v15  ;;  %p610_p5 = pnand %p609_p4, %p750_p9 }
  0x32   : > { %528 = vlog2.f32 %v237_v16  ;;  %v247_v20 = vadd.f32 %v246_v19, %v244_v18  ;;  %p615_p10 = por %p614_p8, %p613_p7 }
  0x33   : > { %p611_p6 = pneg %p610_p5 }
  0x34   : > { %v248_v23 = vrot.slane %v247_v20, 4 }
  0x35   : > { %p616_p13 = pnand %p615_p10, %p611_p6 }
  0x36   : > { %v525_v25 = vpop.eup %524  ;;  %v249_v26 = vadd.f32 %v248_v23, %v247_v20 }
  0x37   : > { %v527_v27 = vpop.eup %526  ;;  %v239_v28 = vmul.f32 0.6931472, %v525_v25 }
  0x38   : > { %v529_v29 = vpop.eup %528  ;;  %v241_v30 = vmul.f32 0.6931472, %v527_v27  ;;  %v250_v31 = vrot.slane %v249_v26, 2 }
  0x39   : > { %v243_v32 = vmul.f32 0.6931472, %v529_v29  ;;  %v276_v33 = vsel %vm273_vm1, %v239_v28, 0.0 }
  0x3a   : > { %v251_v34 = vadd.f32 %v250_v31, %v249_v26  ;;  %v256_v35 = vadd.f32 %v241_v30, %v239_v28  ;;  %v277_v36 = vsel %vm274_vm2, %v241_v30, 0.0 }
  0x3b   : > { %v257_v37 = vsel %vm245_vm0, %v243_v32, 0.0  ;;  %v278_v38 = vsel %vm275_vm3, %v243_v32, 0.0  ;;  %v279_v39 = vadd.f32 %v277_v36, %v276_v33 }
  0x3c   : > { %v252_v40 = vrot.slane %v251_v34, 1  ;;  %v258_v41 = vadd.f32 %v257_v37, %v256_v35  ;;  %v280_v42 = vsel %vm245_vm0, %v278_v38, 0.0 }
  0x3d   : > { %v281_v43 = vadd.f32 %v280_v42, %v279_v39 }
  0x3e   : > { %v253_v44 = vadd.f32 %v252_v40, %v251_v34  ;;  %v259_v45 = vrot.slane %v258_v41, 4 }
  0x3f   : > { %v282_v46 = vrot.slane %v281_v43, 4 }
  0x40   : > { %530 = vlog2.f32 %v253_v44  ;;  %v260_v47 = vadd.f32 %v259_v45, %v258_v41 }
  0x41   : > { %v283_v48 = vadd.f32 %v282_v46, %v281_v43 }
  0x42   : > { %v261_v49 = vrot.slane %v260_v47, 2 }
  0x43   : > { %v284_v50 = vrot.slane %v283_v48, 2 }
  0x44   : > { %v262_v51 = vadd.f32 %v261_v49, %v260_v47 }
  0x45   : > { %v285_v52 = vadd.f32 %v284_v50, %v283_v48 }
  0x46   : > { %v531_v53 = vpop.eup %530  ;;  %v263_v54 = vrot.slane %v262_v51, 1 }
  0x47   : > { %v255_v55 = vmul.f32 0.6931472, %v531_v53  ;;  %v286_v56 = vrot.slane %v285_v52, 1 }
  0x48   : > { %v264_v57 = vadd.f32 %v263_v54, %v262_v51 }
  0x49   : > { %v265_v59 = vmul.f32 18.0, %v255_v55  ;;  %v287_v60 = vadd.f32 %v286_v56, %v285_v52 }
  0x4b   : > { %v266_v62 = vsub.f32 %v264_v57, %v265_v59  ;;  %v288_v63 = vsub.f32 %v287_v60, %v255_v55 }
  0x4d   : > { %v289_v1 = vmul.f32 0.011764706, %v266_v62  ;;  %v290_v2 = vmul.f32 0.7882353, %v288_v63 }
  0x4f   : > { %v291_v3 = vadd.f32 %v290_v2, %v289_v1 }
  0x51   : > { %v292_v4 = vsub.f32 0.0, %v291_v3 }
  0x53   : > { %v300_v6 = vsel %vm299_vm4, %v292_v4, 0.0 }
  0x54   : > { %v302_v7 = vadd.f32 %v301_v5, %v300_v6 }
  0x56   : > { %303 = vst [vmem:[#allocation2] sm:$0x1] %v302_v7 }
  0x5d   : > { %v307_v8 = vld [vmem:[#allocation2] sm:$0x1] }
  0x5e   : > { %v309_v9 = vsel %vm308_vm5, %v307_v8, 0.0 }
  0x5f   : > { %310 = vadd.xlane.f32.xlu0 %v309_v9 }
  0xd2   : > { %v311_v10 = vpop.xlane.xlu0 %310 }
  0xd3   : > { %v312_v11 = vrot.slane %v311_v10, 4 }
  0xd5   : > { %v313_v12 = vadd.f32 %v312_v11, %v311_v10 }
  0xd7   : > { %v314_v13 = vrot.slane %v313_v12, 2 }
  0xd9   : > { %v315_v14 = vadd.f32 %v314_v13, %v313_v12 }
  0xdb   : > { %v316_v15 = vrot.slane %v315_v14, 1 }
  0xdd   : > { %v317_v16 = vadd.f32 %v316_v15, %v315_v14 }
  0xdf   : > { %450 = vpush %v317_v16 }
 0x110   : > { %s451_s29 = spop %450 }
 0x111   : > { %v319_v17 = vstv %s451_s29 }
 0x112   : > { %320 = vst [vmem:[%s215_s19] sm:$0xff] %v319_v17 }
 0x113   : > { %619 = shalt.err (!%p616_p13)
}
 0x114   : > { %456 = dma.vmem_to_hbm [thread:$0]  (%p750_p9), %s335_s20, 128, %s337_s27, %s322_s26  }
 0x115 PF: > { %s348_s3 = sand.u32 1, %s658_s9   ;;  %p466_p0 = pnand %p439_p12, %p757_p11 }
 0x116   : > { %s349_s21 = scalar_lea.sflag [#allocation5], %s348_s3 }
 0x117   : > { %p467_p1 = pneg %p466_p0 }
 0x119   : > { %653 = dma.done.wait (%p467_p1), %s349_s21, 128  }
 0x11a   : > { %655 = vsyncadd (%p467_p1), %s349_s21, 4294967168  ;;  %s21_s14 = sadd.s32 1, %s678_s14   ;;  %s850_s9 = smov %s662_s10 }
 0x11b   : > { %p18_p2 = scmp.ge.s32.totalorder %s21_s14, 4   ;;  %s851_s10 = smov %s666_s11 }
 0x11c   : > { %s852_s11 = smov %s755_s23  ;;  %s853_s12 = smov %s674_s13 }
 0x11d   : > { %s854_s13 = smov %s856_s17  ;;  %20 = sbr.rel (!%p18_p2) target bundleno = 8 (0x8), region = 94 }
 0x122   :  { %355 = vsyncpa [#allocation4], 1 }
 0x123   :  { %357 = vsyncpa [#allocation4 + $0x1], 1 }
 0x124   :  { %358 = vsyncpa [#allocation7], 1 }
 0x125   :  { %360 = vsyncpa [#allocation7 + $0x1], 1 }
 0x126   :  { %361 = vsyncpa [#allocation5], 1 }
 0x127   :  { %363 = vsyncpa [#allocation5 + $0x1], 1 }

</bundles_post_ra>
